<compile_context>
chip_gen: v6e
topology: v6e:2x2x1
jax: 0.10.0
libtpu: 0.0.40
codegen_flags: <defaults>
</compile_context>

<pallas_src>
import jax
import jax.numpy as jnp
from jax.experimental import pallas as pl
from jax.experimental.pallas import tpu as pltpu

BN_EPS = 1e-5
TILE_B = 4096          # rows per grid step; safe vs scoped-VMEM defaults on all gens
PALLAS_MIN_BATCH = 1024  # below this, plain XLA GEMM beats custom-call overhead


def _round_up(x, m):
    return (x + m - 1) // m * m


def dqn_affine_kernel(x_ref, w_ref, b_ref, o_ref):
    # One fused MXU matmul: [tb, 48]bf16 @ [48, 6]bf16 -> f32, then + [1, 6]f32 bias.
    o_ref[...] = (
        jnp.dot(x_ref[...], w_ref[...], preferred_element_type=jnp.float32)
        + b_ref[...]
    )


def _fold_params(p):
    """Fold eval-mode BN into fc1, then collapse fc1->fc2->fc3 into one affine map."""
    s = p["gamma"] * jax.lax.rsqrt(p["running_var"] + BN_EPS)      # [1, 24]
    w1s = p["w1"] * s                                              # scale W1 columns
    b1s = (p["b1"] - p["running_mean"]) * s + p["beta"]            # [1, 24]
    w_eff = w1s @ p["w2"] @ p["w3"]                                # [48, 6]
    b_eff = (b1s @ p["w2"] + p["b2"]) @ p["w3"] + p["b3"]          # [1, 6]
    return w_eff, b_eff


def dqn_forward(x, params, tile_b=TILE_B, force_pallas=False):
    B, f_in = x.shape
    assert f_in == 48, f_in
    w_eff, b_eff = _fold_params(params)
    f_out = w_eff.shape[1]

    # Small-batch fast path: the kernel launch + pipeline setup exceeds the work.
    if not force_pallas and B < PALLAS_MIN_BATCH:
        return x @ w_eff + b_eff

    # bf16 on the streamed operand (HBM-bound: halves x bytes over HBM); MXU
    # takes bf16 natively on v5e/v6e/v7x, accumulation stays f32.
    x_bf = x.astype(jnp.bfloat16)
    w_bf = w_eff.astype(jnp.bfloat16)

    # Batch tiling in multiples of 16 (bf16 sublane packing).  Keep >=2 grid
    # steps when the batch allows so the "parallel" axis shards across both
    # TensorCores on v7x; cap the tile at TILE_B so double-buffered tiles fit
    # the scoped-VMEM default on every generation (v5e 16 MiB .. v7x 32 MiB).
    bp16 = _round_up(B, 16)
    tb = max(16, min(tile_b, _round_up(pl.cdiv(bp16, 2), 16)))
    bp = _round_up(bp16, tb)
    if bp != B:
        x_bf = jnp.pad(x_bf, ((0, bp - B), (0, 0)))

    grid = (bp // tb,)
    cost = pl.CostEstimate(
        flops=2 * bp * f_in * f_out,
        transcendentals=0,
        bytes_accessed=(bp * f_in * 2 + f_in * f_out * 2
                        + bp * f_out * 4 + f_out * 4),
    )

    out = pl.pallas_call(
        dqn_affine_kernel,
        out_shape=jax.ShapeDtypeStruct((bp, f_out), jnp.float32),
        grid=grid,
        in_specs=[
            pl.BlockSpec((tb, f_in), lambda i: (i, 0)),     # x: batch-tiled, pipelined
            pl.BlockSpec((f_in, f_out), lambda i: (0, 0)),  # W_eff: VMEM-resident
            pl.BlockSpec((1, f_out), lambda i: (0, 0)),     # b_eff: VMEM-resident (f32)
        ],
        out_specs=pl.BlockSpec((tb, f_out), lambda i: (i, 0)),
        compiler_params=pltpu.CompilerParams(
            dimension_semantics=("parallel",),  # shard batch tiles across TCs (v7x megacore)
        ),
        cost_estimate=cost,
    )(x_bf, w_bf, b_eff)

    # s.view(s.size(0), -1): already [B, 6]; drop any batch padding.
    return out[:B]


def init_params(key):
    ks = jax.random.split(key, 8)

    def linear(kw, kb, fan_in, fan_out):
        # PyTorch default init: U(-1/sqrt(fan_in), 1/sqrt(fan_in))
        bound = 1.0 / jnp.sqrt(fan_in)
        w = jax.random.uniform(kw, (fan_in, fan_out), jnp.float32, -bound, bound)
        b = jax.random.uniform(kb, (1, fan_out), jnp.float32, -bound, bound)
        return w, b

    w1, b1 = linear(ks[0], ks[1], 48, 24)
    w2, b2 = linear(ks[2], ks[3], 24, 12)
    w3, b3 = linear(ks[4], ks[5], 12, 6)

    return {
        "w1": w1, "b1": b1,
        # BatchNorm1d(24) defaults: gamma=1, beta=0, running_mean=0, running_var=1
        "gamma": jnp.ones((1, 24), jnp.float32),
        "beta": jnp.zeros((1, 24), jnp.float32),
        "running_mean": jnp.zeros((1, 24), jnp.float32),
        "running_var": jnp.ones((1, 24), jnp.float32),
        "w2": w2, "b2": b2,
        "w3": w3, "b3": b3,
    }


def reference_forward(x, p):
    # Unfused, layer-by-layer eval-mode forward (matches the PyTorch module).
    h = x @ p["w1"] + p["b1"]
    h = (h - p["running_mean"]) / jnp.sqrt(p["running_var"] + BN_EPS) * p["gamma"] + p["beta"]
    h = h @ p["w2"] + p["b2"]
    h = h @ p["w3"] + p["b3"]
    return h


if __name__ == "__main__":
    key = jax.random.PRNGKey(0)
    k_x, k_p = jax.random.split(key)

    B = 8
    x = jax.random.normal(k_x, (B, 48), jnp.float32)
    params = init_params(k_p)

    # Force the Pallas path so the kernel itself is exercised at the test shape.
    out = dqn_forward(x, params, force_pallas=True)
    out = jax.block_until_ready(out)
    assert out.shape == (B, 6), out.shape

    # 1) End-to-end vs the full f32 layer-by-layer reference (bf16-appropriate tol).
    ref = reference_forward(x, params)
    assert jnp.allclose(out, ref, atol=3e-2, rtol=3e-2), jnp.max(jnp.abs(out - ref))

    # 2) Kernel exactness vs a reference with the same bf16 quantization of x / W_eff.
    w_eff, b_eff = _fold_params(params)
    qref = (x.astype(jnp.bfloat16).astype(jnp.float32)
            @ w_eff.astype(jnp.bfloat16).astype(jnp.float32) + b_eff)
    assert jnp.allclose(out, qref, atol=1e-4, rtol=1e-4), jnp.max(jnp.abs(out - qref))

    # 3) Small-batch XLA fast path also matches the reference.
    out_fast = dqn_forward(x, params)
    assert jnp.allclose(out_fast, ref, atol=3e-2, rtol=3e-2), jnp.max(jnp.abs(out_fast - ref))

    print("KERNEL_OK")
</pallas_src>

<mosaic_0001>
module attributes {stable_mosaic.version = 11 : i64} {
  func.func @dqn_affine_kernel(%arg0: i32, %arg1: memref<16x48xbf16, #tpu.memory_space<vmem>>, %arg2: memref<48x6xbf16, #tpu.memory_space<vmem>>, %arg3: memref<1x6xf32, #tpu.memory_space<vmem>>, %arg4: memref<16x6xf32, #tpu.memory_space<vmem>>) attributes {dimension_semantics = [#tpu.dimension_semantics<parallel>], iteration_bounds = array<i64: 1>, scalar_prefetch = 0 : i64, scratch_operands = 0 : i64, tpu.core_type = #tpu.core_type<tc>, window_params = [{transform_indices = @transform_0, window_bounds = array<i64: 16, 48>}, {pipeline_mode = #tpu.pipeline_mode<synchronous>, transform_indices = @transform_1, window_bounds = array<i64: 48, 6>}, {pipeline_mode = #tpu.pipeline_mode<synchronous>, transform_indices = @transform_2, window_bounds = array<i64: 1, 6>}, {transform_indices = @transform_3, window_bounds = array<i64: 16, 6>}]} {
    %c0 = arith.constant 0 : index
    %c0_0 = arith.constant 0 : index
    %0 = vector.load %arg1[%c0, %c0_0] : memref<16x48xbf16, #tpu.memory_space<vmem>>, vector<16x48xbf16>
    %c0_1 = arith.constant 0 : index
    %c0_2 = arith.constant 0 : index
    %1 = vector.load %arg2[%c0_1, %c0_2] : memref<48x6xbf16, #tpu.memory_space<vmem>>, vector<48x6xbf16>
    %cst = arith.constant dense<0.000000e+00> : vector<16x6xf32>
    %2 = tpu.matmul %0, %1, %cst {dimension_numbers = #tpu.dot_dimension_numbers<[1], [0], [0], [1], [0, 0, 1, 1], [], []>} : vector<16x48xbf16>, vector<48x6xbf16>, vector<16x6xf32> -> vector<16x6xf32>
    %c0_3 = arith.constant 0 : index
    %c0_4 = arith.constant 0 : index
    %3 = vector.load %arg3[%c0_3, %c0_4] : memref<1x6xf32, #tpu.memory_space<vmem>>, vector<1x6xf32>
    %4 = vector.broadcast %3 : vector<1x6xf32> to vector<16x6xf32>
    %5 = arith.addf %2, %4 : vector<16x6xf32>
    %c0_5 = arith.constant 0 : index
    %c0_6 = arith.constant 0 : index
    %6 = vector.load %arg4[%c0_5, %c0_6] : memref<16x6xf32, #tpu.memory_space<vmem>>, vector<16x6xf32>
    tpu.vector_store %arg4[%c0_5, %c0_6], %5 {strides = array<i32>} : memref<16x6xf32, #tpu.memory_space<vmem>>, vector<16x6xf32>,
    return
  }
  func.func @transform_0(%arg0: i32) -> (i32, i32) {
    %c0_i32 = arith.constant 0 : i32
    %c0_i32_0 = arith.constant 0 : i32
    return %arg0, %c0_i32 : i32, i32
  }
  func.func @transform_1(%arg0: i32) -> (i32, i32) {
    %c0_i32 = arith.constant 0 : i32
    %c0_i32_0 = arith.constant 0 : i32
    %c0_i32_1 = arith.constant 0 : i32
    return %c0_i32, %c0_i32_0 : i32, i32
  }
  func.func @transform_2(%arg0: i32) -> (i32, i32) {
    %c0_i32 = arith.constant 0 : i32
    %c0_i32_0 = arith.constant 0 : i32
    %c0_i32_1 = arith.constant 0 : i32
    return %c0_i32, %c0_i32_0 : i32, i32
  }
  func.func @transform_3(%arg0: i32) -> (i32, i32) {
    %c0_i32 = arith.constant 0 : i32
    %c0_i32_0 = arith.constant 0 : i32
    return %arg0, %c0_i32 : i32, i32
  }
}

</mosaic_0001>

<bundles_post_ra>
// kernel: tpu_custom_call.1
= control target key start
LH: loop header
LB: loop body
LE: loop exit
PB: predicated region body
PF: predicated region fallthrough
CT: control target
= control target key end

     0   :  { %v131_v0 = vmov 0.0   ;;  %vm132_vm0 = vmmov 0   ;;  %vm53_vm1 = vcmask 392192   ;;  %vm98_vm2 = vcmask 48128   ;;  %s174_s1 = inlined_call_operand.vmem [shape: bf16[48,6], index: 1, kind: input, shape index: {}]   ;;  %s175_s0 = inlined_call_operand.vmem [shape: bf16[16,48], index: 0, kind: input, shape index: {}]   ;;  %s176_s2 = inlined_call_operand.vmem [shape: f32[1,6], index: 2, kind: input, shape index: {}]   ;;  %s177_s3 = inlined_call_operand.vmem [shape: f32[16,6], index: 3, kind: output, shape index: {}]  }
   0x1   :  { %115 = vmatprep.subr.bf16.mxu0 %v131_v0  ;;  %v127_v1 = vld [vmem:[%s174_s1 + $0x10] sm:$0xff]   ;;  %121 = vmatprep.mubr.msk.bf16.mxu0 %vm132_vm0, %v131_v0  ;;  %v128_v2 = vld [vmem:[%s174_s1 + $0x8] sm:$0xff]   ;;  %v129_v3 = vld [vmem:[%s174_s1] sm:$0xff]  }
   0x2   :  { %116 = vmatpush3.bf16.msra.mxu0 %v127_v1  ;;  %v130_v4 = vld [vmem:[%s175_s0] sm:$0xff]  }
   0x3   :  { %117 = vmatprep.subr.bf16.mxu0 %v131_v0  ;;  %v105_v5 = vld [vmem:[%s176_s2] ss:$0 sm:$0xff] }
   0x6   :  { %118 = vmatpush3.bf16.msra.mxu0 %v128_v2 }
   0x7   :  { %119 = vmatprep.subr.bf16.mxu0 %v131_v0 }
   0xa   :  { %120 = vmatpush3.bf16.msra.mxu0 %v129_v3 }
   0xd   :  { %122 = vmatmul.mubr.msk.bf16.vlgmr.msra.gmra.mxu0 %vm53_vm1, %v130_v4 }
  0xcd   :  { %v91_v6 = vpop.f32.mrf.mxu0 }
  0xce   :  { %v92_v7 = vadd.f32 %v105_v5, %v91_v6 }
  0xcf   :  { %v123_v8 = vpop.f32.mrf.mxu0 }
  0xd0   :  { %99 = vst.msk [vmem:[%s177_s3] sm:$0xff] %vm98_vm2, %v92_v7 }
  0xd1   :  { %v94_v9 = vpop.f32.mrf.mxu0 }
  0xd2   :  { %v95_v10 = vadd.f32 %v105_v5, %v94_v9 }
  0xd3   :  { %v124_v11 = vpop.f32.mrf.mxu0 }
  0xd4   :  { %100 = vst.msk [vmem:[%s177_s3 + $0x8] sm:$0xff] %vm98_vm2, %v95_v10 }

</bundles_post_ra>
